<compile_context>
chip_gen: v7x
topology: tpu7x:2x2x1
jax: 0.10.0
libtpu: 0.0.40
codegen_flags: <defaults>
</compile_context>

<pallas_src>
import functools

import jax
import jax.numpy as jnp
import numpy as np
from jax import lax
from jax.experimental import pallas as pl
from jax.experimental.pallas import tpu as pltpu


# --------------------------------------------------------------------------
# Pallas kernel: fused (K, 1) conv tile with bias + leaky_relu
# --------------------------------------------------------------------------
def _conv_core_kernel(x_ref, w_ref, b_ref, o_ref, *, stride, apply_act,
                      negative_slope):
    """One output tile of a (K,1) conv.

    x_ref: (H_r, stride*C_t)  activation block, stride phase folded into lanes
    w_ref: (K, C_t, co_blk)   per-tap weights (bf16), resident across inner axis
    b_ref: (1, co_blk)        bias (f32)
    o_ref: (H_out, co_blk)    output block
    """
    K, c_t, _ = w_ref.shape
    h_out = o_ref.shape[0]

    acc = jnp.zeros(o_ref.shape, dtype=jnp.float32)
    for k in range(K):                       # static unroll, K <= 5
        r0 = k // stride                     # contiguous sublane offset
        c0 = (k % stride) * c_t              # 0 or 128-aligned lane offset
        xk = x_ref[pl.ds(r0, h_out), pl.ds(c0, c_t)]
        acc = acc + jnp.dot(xk.astype(w_ref.dtype), w_ref[k],
                            preferred_element_type=jnp.float32)
    acc = acc + b_ref[...]
    if apply_act:
        acc = jnp.where(acc >= 0, acc, negative_slope * acc)
    o_ref[...] = acc.astype(o_ref.dtype)


def _conv_core(x_r, w_taps, b, *, stride, h_out, apply_act,
               negative_slope=0.1, co_blk_max=256):
    """pallas_call wrapper: grid = (co blocks OUTER, batch rows INNER)."""
    N, H_r, L = x_r.shape
    K, C_t, C_out = w_taps.shape
    assert L == stride * C_t
    co_blk = min(co_blk_max, C_out)
    assert C_out % co_blk == 0
    n_co = C_out // co_blk
    b2 = b.reshape(1, C_out).astype(jnp.float32)

    cost = pl.CostEstimate(
        flops=2 * N * h_out * K * C_t * C_out,
        transcendentals=0,
        bytes_accessed=int(x_r.size * x_r.dtype.itemsize
                           + w_taps.size * w_taps.dtype.itemsize
                           + N * h_out * C_out * 4),
    )

    return pl.pallas_call(
        functools.partial(_conv_core_kernel, stride=stride,
                          apply_act=apply_act, negative_slope=negative_slope),
        out_shape=jax.ShapeDtypeStruct((N, h_out, C_out), jnp.float32),
        grid_spec=pltpu.PrefetchScalarGridSpec(
            num_scalar_prefetch=0,
            grid=(n_co, N),   # weight block index constant over the inner axis
            in_specs=[
                pl.BlockSpec((None, H_r, L), lambda j, n: (n, 0, 0)),
                pl.BlockSpec((K, C_t, co_blk), lambda j, n: (0, 0, j)),
                pl.BlockSpec((1, co_blk), lambda j, n: (0, j)),
            ],
            out_specs=pl.BlockSpec((None, h_out, co_blk),
                                   lambda j, n: (n, 0, j)),
        ),
        compiler_params=pltpu.CompilerParams(
            dimension_semantics=("parallel", "parallel"),
            vmem_limit_bytes=32 * 1024 * 1024,   # safe on v5e / v6e / v7x
        ),
        cost_estimate=cost,
    )(x_r, w_taps, b2)


# --------------------------------------------------------------------------
# Per-layer glue: build the fused-im2col (or tiny-layer patches) operands
# --------------------------------------------------------------------------
def conv_h(x, w, b, *, stride, pad, apply_act, negative_slope=0.1):
    """Conv2d with kernel (K,1) over H, channels-last.

    x: (N, H, C_in) f32, w: (C_out, C_in, K), b: (C_out,) -> (N, H_out, C_out).
    """
    N, H, C_in = x.shape
    C_out, _, K = w.shape
    s = stride
    H_out = (H + 2 * pad - K) // s + 1
    # torch conv: out[co,h] = sum_{ci,k} W[co,ci,k] * x_pad[ci, h*s + k]
    w_taps = jnp.transpose(w, (2, 1, 0)).astype(jnp.bfloat16)   # (K, C_in, C_out)

    if s == 1 or C_in % 128 == 0:
        # Fused im2col: fold the stride phase into lanes with a free reshape,
        # so tap k lives at (row k//s, lane offset (k%s)*C_in) of x_r.
        H_r = H_out + (K - 1) // s
        H_need = s * H_r
        Hp = H + 2 * pad
        x_pad = jnp.pad(x, ((0, 0), (pad, pad), (0, 0)))
        if H_need <= Hp:
            x_pad = x_pad[:, :H_need, :]
        else:
            x_pad = jnp.pad(x_pad, ((0, 0), (0, H_need - Hp), (0, 0)))
        x_r = x_pad.reshape(N, H_r, s * C_in)                   # no data movement
        return _conv_core(x_r, w_taps, b, stride=s, h_out=H_out,
                          apply_act=apply_act, negative_slope=negative_slope)

    # Tiny layers (C_in = num_emg_channels or 32): classic im2col patches
    # (a few KB) fed through the same kernel as a single-tap dot — a per-tap
    # contraction of 4 lanes would leave the MXU almost empty.
    x_pad = jnp.pad(x, ((0, 0), (pad, pad), (0, 0)))
    cols = [x_pad[:, k: k + (H_out - 1) * s + 1: s, :] for k in range(K)]
    patches = jnp.concatenate(cols, axis=-1)                    # (N, H_out, K*C_in)
    w_flat = w_taps.reshape(1, K * C_in, C_out)
    return _conv_core(patches, w_flat, b, stride=1, h_out=H_out,
                      apply_act=apply_act, negative_slope=negative_slope)


# --------------------------------------------------------------------------
# Module parameters / forward / reference
# --------------------------------------------------------------------------
def init_params(key, num_emg_channels):
    # NOTE: weight_norm / spectral_norm at default init is the identity on the
    # forward pass (g = ||v||), so plain deterministic weights reproduce the
    # forward semantics exactly.
    cfg = [
        # (C_in, C_out, K, stride, pad, leaky_relu?)
        (num_emg_channels, 32, 5, 3, 2, True),
        (32, 128, 5, 3, 2, True),
        (128, 512, 5, 3, 2, True),
        (512, 1024, 5, 3, 2, True),
        (1024, 1024, 5, 1, 2, True),
        (1024, 1, 3, 1, 1, False),   # self.output (no activation)
    ]
    params = []
    for ci, co, k, st, p, act in cfg:
        key, kw, kb = jax.random.split(key, 3)
        w = jax.random.normal(kw, (co, ci, k), jnp.float32) / np.sqrt(ci * k)
        b = 0.01 * jax.random.normal(kb, (co,), jnp.float32)
        params.append(dict(w=w, b=b, stride=st, pad=p, act=act))
    return params


def discriminator_p_forward(x, params, period):
    """x: (B, num_emg_channels, T) -> list of fmaps in PyTorch NCHW layout."""
    B, C, T = x.shape
    # Matches torch: pads a full `period` when T % period == 0 (reflect pad).
    n_pad = period - (T % period)
    x = jnp.pad(x, ((0, 0), (0, 0), (0, n_pad)), mode="reflect")
    H = (T + n_pad) // period
    x = x.reshape(B, C, H, period)                                # NCHW view
    x = jnp.transpose(x, (0, 3, 2, 1)).reshape(B * period, H, C)  # (B*W, H, C)

    fmaps = []
    for p in params:
        w, b = p["w"], p["b"]
        pad_co = 0
        if w.shape[0] == 1:
            # final 1024 -> 1 conv: pad C_out to 128 lanes (dense stores, full
            # MXU columns); slice the real channel outside the kernel.
            pad_co = 128 - w.shape[0]
            w = jnp.pad(w, ((0, pad_co), (0, 0), (0, 0)))
            b = jnp.pad(b, (0, pad_co))
        y = conv_h(x, w, b, stride=p["stride"], pad=p["pad"], apply_act=p["act"])
        if pad_co:
            y = y[:, :, :1]
        x = y
        fmaps.append(y)

    # back to PyTorch NCHW: (B, C_out, H_out, period)
    out = []
    for f in fmaps:
        _, h, c = f.shape
        out.append(jnp.transpose(f.reshape(B, period, h, c), (0, 3, 2, 1)))
    return out


def discriminator_p_reference(x, params, period):
    """Pure-JAX reference (lax.conv, full f32 precision) of the same forward."""
    B, C, T = x.shape
    n_pad = period - (T % period)
    x = jnp.pad(x, ((0, 0), (0, 0), (0, n_pad)), mode="reflect")
    H = (T + n_pad) // period
    x = x.reshape(B, C, H, period)
    fmaps = []
    for p in params:
        w4 = p["w"][:, :, :, None]                               # (C_out, C_in, K, 1)
        y = lax.conv_general_dilated(
            x, w4,
            window_strides=(p["stride"], 1),
            padding=((p["pad"], p["pad"]), (0, 0)),
            dimension_numbers=("NCHW", "OIHW", "NCHW"),
            precision=lax.Precision.HIGHEST,
        ) + p["b"].reshape(1, -1, 1, 1)
        if p["act"]:
            y = jnp.where(y >= 0, y, 0.1 * y)
        x = y
        fmaps.append(y)
    return fmaps


if __name__ == "__main__":
    key = jax.random.PRNGKey(0)
    key, kx = jax.random.split(key)

    B, C, T, period = 2, 4, 64, 2
    x = jax.random.normal(kx, (B, C, T), jnp.float32)
    params = init_params(key, C)

    fmaps = discriminator_p_forward(x, params, period)
    fmaps = jax.block_until_ready(fmaps)

    # Tolerance is relaxed on purpose: the kernel runs the MXU at bf16
    # (DEFAULT) precision with f32 accumulation, the reference at HIGHEST.
    ref = discriminator_p_reference(x, params, period)
    for a, r in zip(fmaps, ref):
        assert a.shape == r.shape, (a.shape, r.shape)
        np.testing.assert_allclose(np.asarray(a), np.asarray(r),
                                   rtol=5e-2, atol=5e-2)

    print("KERNEL_OK")
</pallas_src>

<mosaic_0001>
module attributes {stable_mosaic.version = 11 : i64} {
  func.func @_conv_core_kernel(%arg0: i32, %arg1: i32, %arg2: memref<1x11x20xf32, #tpu.memory_space<vmem>>, %arg3: memref<1x20x32xbf16, #tpu.memory_space<vmem>>, %arg4: memref<1x32xf32, #tpu.memory_space<vmem>>, %arg5: memref<1x11x32xf32, #tpu.memory_space<vmem>>) attributes {dimension_semantics = [#tpu.dimension_semantics<parallel>, #tpu.dimension_semantics<parallel>], iteration_bounds = array<i64: 1, 4>, scalar_prefetch = 0 : i64, scratch_operands = 0 : i64, tpu.core_type = #tpu.core_type<tc>, window_params = [{transform_indices = @transform_0, window_bounds = array<i64: 1, 11, 20>}, {transform_indices = @transform_1, window_bounds = array<i64: 1, 20, 32>}, {transform_indices = @transform_2, window_bounds = array<i64: 1, 32>}, {transform_indices = @transform_3, window_bounds = array<i64: 1, 11, 32>}]} {
    %cst = arith.constant 0.000000e+00 : f32
    %0 = vector.broadcast %cst : f32 to vector<11x32xf32>
    %c0 = arith.constant 0 : index
    %c0_0 = arith.constant 0 : index
    %c0_1 = arith.constant 0 : index
    %1 = vector.load %arg2[%c0, %c0_0, %c0_1] : memref<1x11x20xf32, #tpu.memory_space<vmem>>, vector<1x11x20xf32>
    %2 = vector.shape_cast %1 : vector<1x11x20xf32> to vector<11x20xf32>
    %3 = arith.truncf %2 : vector<11x20xf32> to vector<11x20xbf16>
    %c0_2 = arith.constant 0 : index
    %c0_3 = arith.constant 0 : index
    %c0_4 = arith.constant 0 : index
    %4 = vector.load %arg3[%c0_2, %c0_3, %c0_4] : memref<1x20x32xbf16, #tpu.memory_space<vmem>>, vector<1x20x32xbf16>
    %5 = vector.shape_cast %4 : vector<1x20x32xbf16> to vector<20x32xbf16>
    %cst_5 = arith.constant dense<0.000000e+00> : vector<11x32xf32>
    %6 = tpu.matmul %3, %5, %cst_5 {dimension_numbers = #tpu.dot_dimension_numbers<[1], [0], [0], [1], [0, 0, 1, 1], [], []>} : vector<11x20xbf16>, vector<20x32xbf16>, vector<11x32xf32> -> vector<11x32xf32>
    %7 = arith.addf %0, %6 : vector<11x32xf32>
    %c0_6 = arith.constant 0 : index
    %c0_7 = arith.constant 0 : index
    %8 = vector.load %arg4[%c0_6, %c0_7] : memref<1x32xf32, #tpu.memory_space<vmem>>, vector<1x32xf32>
    %9 = vector.broadcast %8 : vector<1x32xf32> to vector<11x32xf32>
    %10 = arith.addf %7, %9 : vector<11x32xf32>
    %cst_8 = arith.constant 0.000000e+00 : f32
    %11 = vector.broadcast %cst_8 : f32 to vector<11x32xf32>
    %12 = arith.cmpf oge, %10, %11 : vector<11x32xf32>
    %cst_9 = arith.constant 1.000000e-01 : f32
    %13 = vector.broadcast %cst_9 : f32 to vector<11x32xf32>
    %14 = arith.mulf %13, %10 : vector<11x32xf32>
    %15 = arith.select %12, %10, %14 : vector<11x32xi1>, vector<11x32xf32>
    %c0_10 = arith.constant 0 : index
    %c0_11 = arith.constant 0 : index
    %c0_12 = arith.constant 0 : index
    %16 = vector.load %arg5[%c0_10, %c0_11, %c0_12] : memref<1x11x32xf32, #tpu.memory_space<vmem>>, vector<1x11x32xf32>
    %17 = vector.shape_cast %16 : vector<1x11x32xf32> to vector<11x32xf32>
    %18 = vector.shape_cast %15 : vector<11x32xf32> to vector<1x11x32xf32>
    tpu.vector_store %arg5[%c0_10, %c0_11, %c0_12], %18 {strides = array<i32>} : memref<1x11x32xf32, #tpu.memory_space<vmem>>, vector<1x11x32xf32>,
    return
  }
  func.func @transform_0(%arg0: i32, %arg1: i32) -> (i32, i32, i32) {
    %c0_i32 = arith.constant 0 : i32
    %c0_i32_0 = arith.constant 0 : i32
    %c0_i32_1 = arith.constant 0 : i32
    return %arg1, %c0_i32, %c0_i32_0 : i32, i32, i32
  }
  func.func @transform_1(%arg0: i32, %arg1: i32) -> (i32, i32, i32) {
    %c0_i32 = arith.constant 0 : i32
    %c0_i32_0 = arith.constant 0 : i32
    %c0_i32_1 = arith.constant 0 : i32
    return %c0_i32, %c0_i32_0, %arg0 : i32, i32, i32
  }
  func.func @transform_2(%arg0: i32, %arg1: i32) -> (i32, i32) {
    %c0_i32 = arith.constant 0 : i32
    %c0_i32_0 = arith.constant 0 : i32
    return %c0_i32, %arg0 : i32, i32
  }
  func.func @transform_3(%arg0: i32, %arg1: i32) -> (i32, i32, i32) {
    %c0_i32 = arith.constant 0 : i32
    %c0_i32_0 = arith.constant 0 : i32
    return %arg1, %c0_i32, %arg0 : i32, i32, i32
  }
}

</mosaic_0001>

<bundles_post_ra>
// kernel: tpu_custom_call.1
= control target key start
LH: loop header
LB: loop body
LE: loop exit
PB: predicated region body
PF: predicated region fallthrough
CT: control target
= control target key end

     0   :  { %s513_s12 = smov 0   ;;  %s515_s13 = smov 0   ;;  %s555_s0 = inlined_call_operand.vmem [shape: f32[4,11,20], index: 0, kind: input, shape index: {}]   ;;  %s556_s1 = inlined_call_operand.vmem [shape: bf16[1,20,32], index: 1, kind: input, shape index: {}]   ;;  %s557_s2 = inlined_call_operand.vmem [shape: f32[1,32], index: 2, kind: input, shape index: {}]   ;;  %s558_s3 = inlined_call_operand.vmem [shape: f32[4,11,32], index: 3, kind: output, shape index: {}]  }
   0x1   :  { %s517_s14 = smov 0  }
   0x2 LB: > { %s22_s15 = sadd.s32 1, %s485_s13  ;;  %p415_p0 = scmp.ge.s32.totalorder %s489_s14, 1  ;;  %s489_s14 = sphi %s517_s14, %s13_s14   ;;  %s485_s13 = sphi %s515_s13, %s560_s13   ;;  %s481_s12 = sphi %s513_s12, %s559_s12  }
   0x3   : > { %p23_p1 = scmp.ge.s32.totalorder %s22_s15, 4  ;;  %p168_p2 = scmp.lt.s32.totalorder %s489_s14, 5 }
   0x5   : > { %s562_s15 = smov (%p23_p1, %s22_s15), 0  ;;  %p169_p3 = pnand %p415_p0, %p168_p2 }
   0x6   : > { %v465_v0 = vld [vmem:[%s556_s1] sm:$0xff] (!%p169_p3)   ;;  %v491_v1 = vmov (!%p169_p3), 0.0   ;;  %v466_v2 = vld [vmem:[%s556_s1 + $0x8] ss:$0 sps:$4 sm:$0x33] (!%p169_p3)   ;;  %vm249_vm0 = vcmask (!%p169_p3), 1041408  }
   0x7   : > { %172 = sbr.rel (%p169_p3) target bundleno = 240 (0xf0), region = 32  ;;  %431 = vmatprep.subr.bf16.mxu0 (!%p169_p3), %v491_v1  ;;  %p202_p4 = scmp.lt.s32.totalorder (!%p169_p3), %s481_s12, 3  ;;  %v251_v3 = vsel (!%p169_p3), %vm249_vm0, %v466_v2, 0  ;;  %vm492_vm1 = vmmov (!%p169_p3), 0   ;;  %vm245_vm2 = vcmask (!%p169_p3), 162816   ;;  %vm300_vm4 = vcmask (!%p169_p3), 261120  }
   0x8   : > { %432 = vmatpush3.bf16.msra.mxu0 (!%p169_p3), %v465_v0  ;;  %435 = vmatprep.mubr.msk.bf16.mxu0 (!%p169_p3), %vm492_vm1, %v491_v1  ;;  %v420_v7 = vld [vmem:[%s557_s2] ss:$0 sm:$0xff] (!%p169_p3)  ;;  %vm302_vm6 = vcmask (!%p169_p3), 256000  }
   0x9   : > { %433 = vmatprep.subr.bf16.mxu0 (!%p169_p3), %v491_v1 }
   0xc   : > { %434 = vmatpush3.bf16.msra.mxu0 (!%p169_p3), %v251_v3 }
   0xe   : > { %s564_s12 = smov (!%p202_p4, %s481_s12), 3 }
   0xf   : > { %s426_s20 = sshll.u32 %s564_s12, 4 }
  0x10   : > { %s206_s23 = scalar_lea.vmem %s555_s0, %s426_s20  ;;  %s221_s28 = scalar_lea.vmem %s558_s3, %s426_s20 }
  0x11   : > { %v223_v4 = vld [vmem:[%s206_s23] sm:$0xff]  ;;  %v224_v5 = vld [vmem:[%s206_s23 + $0x8] sm:$0x7] }
  0x12   : > { %v225_v6 = vpack.c.bf16 %v224_v5, %v223_v4 }
  0x14   : > { %436 = vmatmul.mubr.msk.bf16.vlgmr.msra.gmra.mrb[0].mxu0 %vm245_vm2, %v225_v6 }
  0xe7   : > { %v287_v8 = vpop.f32.mrb[0].mxu0 }
  0xe8   : > { %v288_v9 = vadd.f32 %v420_v7, %v287_v8  ;;  %v437_v10 = vpop.f32.mrb[1].mxu0 }
  0xe9   : > { %v290_v11 = vpop.f32.mrb[2].mxu0 }
  0xea   : > { %vm294_vm3 = vcmp.ge.f32.partialorder %v288_v9, 0.0  ;;  %v296_v12 = vmul.f32 0.1, %v288_v9  ;;  %v291_v13 = vadd.f32 %v420_v7, %v290_v11  ;;  %v438_v14 = vpop.f32.mrb[3].mxu0 }
  0xec   : > { %v298_v15 = vsel %vm294_vm3, %v288_v9, %v296_v12  ;;  %vm295_vm5 = vcmp.ge.f32.partialorder %v291_v13, 0.0  ;;  %v297_v16 = vmul.f32 0.1, %v291_v13 }
  0xed   : > { %301 = vst.msk [vmem:[%s221_s28] sm:$0xff] %vm300_vm4, %v298_v15 }
  0xee   : > { %v299_v17 = vsel %vm295_vm5, %v291_v13, %v297_v16 }
  0xef   : > { %303 = vst.msk [vmem:[%s221_s28 + $0x8] sm:$0x7] %vm302_vm6, %v299_v17 }
  0xf0 PF: > { %s13_s14 = sadd.s32 1, %s489_s14   ;;  %s559_s12 = smov %s485_s13 }
  0xf1   : > { %p10_p5 = scmp.ge.s32.totalorder %s13_s14, 6   ;;  %s560_s13 = smov %s562_s15 }
  0xf3   :  { %12 = sbr.rel (!%p10_p5) target bundleno = 2 (0x2), region = 68 }

</bundles_post_ra>
